<compile_context>
chip_gen: v7x
topology: tpu7x:2x2x1
jax: 0.10.0
libtpu: 0.0.40
codegen_flags: <defaults>
</compile_context>

<pallas_src>
import jax
import jax.numpy as jnp
from jax.experimental import pallas as pl
from jax.experimental.pallas import tpu as pltpu


def _round_up(x, m):
    return ((x + m - 1) // m) * m


def _sublane_multiple(itemsize):
    # Packed sublane tiling: f32 -> 8, bf16 -> 16, int8/fp8 -> 32.
    return max(8, 32 // max(1, itemsize))


def _tile_cap_and_vmem_budget():
    """Per-generation row-tile cap and lane-padded VMEM budget (bytes).

    Budgets are chosen against each generation's scoped-VMEM *default* so no
    vmem_limit_bytes override is needed:
      v5e : 16 MiB scoped  -> budget 12 MiB, cap 4096 rows
      v6e : 32 MiB scoped  -> budget 24 MiB, cap 8192 rows
      v7x : 32 MiB scoped (64 MiB physical per TC) -> same as v6e; the
            lane-padded accounting below is what keeps us inside it.
    Unknown device kinds fall back to the conservative v5e policy.
    """
    kind = ""
    try:
        kind = jax.devices()[0].device_kind.lower()
    except Exception:  # pragma: no cover - device query should not fail on TPU
        pass
    if ("v6" in kind) or ("v7" in kind):
        return 8192, 24 * 1024 * 1024
    return 4096, 12 * 1024 * 1024


def _pad_copy_kernel(x_ref, o_ref):
    """Zero-pad copy with a single store per tile.

    Builds the padded (tile_n, d_out) block in registers and writes it once:
      o[:, :d_in] = x ; o[:, d_in:] = 0
    """
    x = x_ref[...]
    d_in = x_ref.shape[1]
    d_out = o_ref.shape[1]
    if d_out == d_in:  # static Python branch; not taken on the pad path
        o_ref[...] = x
    else:
        pad = jnp.zeros((x.shape[0], d_out - d_in), dtype=x.dtype)
        o_ref[...] = jnp.concatenate([x, pad], axis=1)


def norm_flow_forward(x, increased_size, tile_n=None, use_pallas=True):
    """Pallas implementation of NormFlow.forward. Returns {'data': y}."""
    if not increased_size:
        # Pure identity: skip the kernel entirely (no HBM traffic, no launch).
        return {"data": x}

    if not use_pallas:
        # Recommended fast path when materialization is not contractually
        # required to go through a custom kernel: XLA pad hits the HBM
        # roofline with zero per-grid-step overhead.
        return {"data": jnp.pad(x, ((0, 0), (0, 1)))}

    n, d_in = x.shape
    d_out = d_in + 1
    itemsize = jnp.dtype(x.dtype).itemsize
    sub = _sublane_multiple(itemsize)
    cap, vmem_budget = _tile_cap_and_vmem_budget()

    if tile_n is None:
        # Row tile: multiple of the dtype's packed sublane count, capped per
        # generation so big tiles amortize the ~0.35 µs fixed per-step cost.
        tile_n = min(cap, _round_up(n, sub))
        # Lane-padded VMEM accounting: each (tile_n, 9/10) block pads its last
        # dim to 128 lanes in VMEM, and BlockSpec double-buffers input+output:
        #   bytes ≈ 2 (bufs) × 2 (in+out) × tile_n × 128 × itemsize
        while tile_n > sub and 2 * 2 * tile_n * 128 * itemsize > vmem_budget:
            tile_n //= 2
    tile_n = max(sub, (tile_n // sub) * sub)

    grid = (pl.cdiv(n, tile_n),)
    # NOTE: if tiles must stay small (tiny N), pipeline_mode=pl.Buffered(3) on
    # both specs would hide the exposed DMA latency; not needed at these sizes.
    y = pl.pallas_call(
        _pad_copy_kernel,
        out_shape=jax.ShapeDtypeStruct((n, d_out), x.dtype),
        grid=grid,
        # Feature dim equals the full array dim (9 / 10), so the (8,128) rule
        # is satisfied; row tile is a multiple of the sublane pack. Partial
        # last block (when tile_n does not divide n) is handled by Pallas
        # masking.
        in_specs=[pl.BlockSpec((tile_n, d_in), lambda i: (i, 0))],
        out_specs=pl.BlockSpec((tile_n, d_out), lambda i: (i, 0)),
        compiler_params=pltpu.CompilerParams(
            dimension_semantics=("parallel",)),  # v7x: shard tiles over 2 TCs
    )(x)
    return {"data": y}


class NormFlowPallas:
    """JAX/Pallas port of model/normalising_flow.py::NormFlow (forward pass).

    The normalizing-flow `model` built in __init__ is NOT consumed by
    forward() (only by loss_function / anomaly_score), so its parameters are
    initialised deterministically here for shape fidelity but unused in the
    hot path.
    """

    def __init__(self, use_spline=False, input_dims=9, num_layers=8,
                 hidden_layers=2, hidden_units=64, func_type="Tanh"):
        self.num_dims = input_dims
        self.num_layers = num_layers
        self.hidden_layers = hidden_layers
        self.hidden_units = hidden_units
        self.func_type = func_type
        self.increased_size = False

        key = jax.random.PRNGKey(0)
        self.params = []
        if use_spline:
            # Autoregressive-quadratic-spline branch: forward() is a pure
            # pass-through (no padding).  Flow parameters are unused here.
            # TODO(synk): nf.flows.AutoregressiveRationalQuadraticSpline /
            # LULinearPermute only matter for log_prob/loss, not forward().
            pass
        else:
            if self.num_dims % 2 != 0:
                self.num_dims += 1
                self.increased_size = True
            # Deterministic init of the RealNVP MLP param maps (shape-faithful,
            # unused by forward()):
            sizes = ([self.num_dims // 2]
                     + [self.hidden_units] * self.hidden_layers
                     + [self.num_dims])
            for _ in range(self.num_layers):
                layer_params = []
                for li in range(len(sizes) - 1):
                    key, wk = jax.random.split(key)
                    last = li == len(sizes) - 2
                    w = (jnp.zeros((sizes[li], sizes[li + 1]), jnp.float32)
                         if last else
                         0.05 * jax.random.normal(
                             wk, (sizes[li], sizes[li + 1]), jnp.float32))
                    b = jnp.zeros((sizes[li + 1],), jnp.float32)
                    layer_params.append((w, b))
                key, pk = jax.random.split(key)
                perm = jax.random.permutation(pk, self.num_dims)
                self.params.append((layer_params, perm))
            self.base_loc = jnp.zeros((self.num_dims,), jnp.float32)
            self.base_log_scale = jnp.zeros((self.num_dims,), jnp.float32)

    def forward(self, x, tile_n=None, use_pallas=True):
        return norm_flow_forward(x, self.increased_size, tile_n=tile_n,
                                 use_pallas=use_pallas)


if __name__ == "__main__":
    key = jax.random.PRNGKey(0)

    # Case 1: RealNVP branch, odd input_dims=9 -> increased_size=True,
    # forward pads a zero column (D: 9 -> 10).  Single-tile path.
    batch, d_in = 8, 9
    x = jax.random.normal(key, (batch, d_in), dtype=jnp.float32)
    m = NormFlowPallas(use_spline=False, input_dims=d_in)
    out = m.forward(x)
    y = jax.block_until_ready(out["data"])
    assert y.shape == (batch, d_in + 1)
    assert jnp.allclose(y[:, :d_in], x)
    assert jnp.allclose(y[:, d_in:], 0.0)

    # Case 2: spline branch (even D) -> identity, no kernel launch.
    d_even = 10
    x2 = jax.random.normal(jax.random.PRNGKey(1), (batch, d_even),
                           dtype=jnp.float32)
    m2 = NormFlowPallas(use_spline=True, input_dims=d_even)
    out2 = m2.forward(x2)
    y2 = jax.block_until_ready(out2["data"])
    assert y2.shape == (batch, d_even)
    assert jnp.allclose(y2, x2)

    # Case 3: multi-tile pad path with a partial last block
    # (136 rows, 64-row tiles -> 3 grid steps, last one masked).
    batch3 = 136
    x3 = jax.random.normal(jax.random.PRNGKey(2), (batch3, d_in),
                           dtype=jnp.float32)
    out3 = m.forward(x3, tile_n=64)
    y3 = jax.block_until_ready(out3["data"])
    assert y3.shape == (batch3, d_in + 1)
    assert jnp.allclose(y3[:, :d_in], x3)
    assert jnp.allclose(y3[:, d_in:], 0.0)

    # Case 4: auto tile selection path (cap + lane-padded budget logic),
    # cross-checked against the jnp.pad fallback.
    batch4 = 600
    x4 = jax.random.normal(jax.random.PRNGKey(3), (batch4, d_in),
                           dtype=jnp.float32)
    y4 = jax.block_until_ready(m.forward(x4)["data"])
    y4_ref = jax.block_until_ready(m.forward(x4, use_pallas=False)["data"])
    assert y4.shape == (batch4, d_in + 1)
    assert jnp.allclose(y4, y4_ref)

    print("KERNEL_OK")
</pallas_src>

<mosaic_0001>
module attributes {stable_mosaic.version = 11 : i64} {
  func.func @_pad_copy_kernel(%arg0: i32, %arg1: memref<8x9xf32, #tpu.memory_space<vmem>>, %arg2: memref<8x10xf32, #tpu.memory_space<vmem>>) attributes {dimension_semantics = [#tpu.dimension_semantics<parallel>], iteration_bounds = array<i64: 1>, scalar_prefetch = 0 : i64, scratch_operands = 0 : i64, tpu.core_type = #tpu.core_type<tc>, window_params = [{transform_indices = @transform_0, window_bounds = array<i64: 8, 9>}, {transform_indices = @transform_1, window_bounds = array<i64: 8, 10>}]} {
    %c0 = arith.constant 0 : index
    %c0_0 = arith.constant 0 : index
    %0 = vector.load %arg1[%c0, %c0_0] : memref<8x9xf32, #tpu.memory_space<vmem>>, vector<8x9xf32>
    %cst = arith.constant 0.000000e+00 : f32
    %1 = vector.broadcast %cst : f32 to vector<8x1xf32>
    %2 = tpu.concatenate %0, %1 in 1 : vector<8x9xf32>, vector<8x1xf32> -> vector<8x10xf32>
    %c0_1 = arith.constant 0 : index
    %c0_2 = arith.constant 0 : index
    %3 = vector.load %arg2[%c0_1, %c0_2] : memref<8x10xf32, #tpu.memory_space<vmem>>, vector<8x10xf32>
    tpu.vector_store %arg2[%c0_1, %c0_2], %2 {strides = array<i32>} : memref<8x10xf32, #tpu.memory_space<vmem>>, vector<8x10xf32>,
    return
  }
  func.func @transform_0(%arg0: i32) -> (i32, i32) {
    %c0_i32 = arith.constant 0 : i32
    %c0_i32_0 = arith.constant 0 : i32
    return %arg0, %c0_i32 : i32, i32
  }
  func.func @transform_1(%arg0: i32) -> (i32, i32) {
    %c0_i32 = arith.constant 0 : i32
    %c0_i32_0 = arith.constant 0 : i32
    return %arg0, %c0_i32 : i32, i32
  }
}

</mosaic_0001>

<bundles_post_ra>
// kernel: tpu_custom_call.1
= control target key start
LH: loop header
LB: loop body
LE: loop exit
PB: predicated region body
PF: predicated region fallthrough
CT: control target
= control target key end

     0   :  { %6 = vsyncpa [#allocation3], 0  ;;  %s127_s0 = inlined_call_operand.hbm [shape: f32[8,9], index: 0, kind: input, shape index: {}]   ;;  %s128_s1 = inlined_call_operand.hbm [shape: f32[8,10], index: 1, kind: output, shape index: {}]  }
   0x1   :  { %7 = vsyncpa [#allocation4], 0  ;;  %s91_s6 = smov [#allocation2]   ;;  %s43_s10 = scalar_lea.hbm %s127_s0, 128 }
   0x2   :  { %s14_s7 = sshll.u32 %s91_s6, 4  ;;  %p44_p0 = scmp.ne.s32.totalorder %s127_s0, %s43_s10  ;;  %s15_s7 = int_to_ptr.vmem [resolvable:$true] %s14_s7 }
   0x3   :  { %p47_p1 = scmp.lt.u32.totalorder %s43_s10, %s127_s0 }
   0x5   :  { %p49_p2 = pnand %p47_p1, %p44_p0 }
   0x7   :  { %52 = shalt.err (!%p49_p2)
}
   0x8   :  { %s53_s15 = scalar_lea.vmem %s15_s7, 128  ;;  %p58_p4 = scmp.lt.s32.totalorder %s15_s7, %s15_s7 }
   0x9   :  { %p54_p3 = scmp.ne.s32.totalorder %s15_s7, %s53_s15  ;;  %p59_p5 = scmp.lt.s32.totalorder %s53_s15, %s53_s15 }
   0xb   :  { %p60_p6 = por %p59_p5, %p58_p4 }
   0xd   :  { %p61_p7 = pnand %p60_p6, %p54_p3 }
   0xf   :  { %64 = shalt.err (!%p61_p7)
}
  0x10   :  { %17 = dma.hbm_to_vmem [thread:$0]  %s127_s0, 128, %s15_s7, [#allocation3]  }
  0x11   :  { %87 = dma.done.wait [#allocation3], 128  }
  0x12   :  { %88 = vsyncadd [#allocation3], 4294967168  ;;  %s92_s18 = smov [#allocation5]   ;;  %vm22_vm0 = vcmask 72704   ;;  %vm24_vm1 = vcmask 80896   ;;  %v21_v0 = vld [vmem:[#allocation2] sm:$0xff] }
  0x13   :  { %s32_s19 = sshll.u32 %s92_s18, 4  ;;  %v23_v1 = vsel %vm22_vm0, %v21_v0, 0.0  ;;  %s33_s19 = int_to_ptr.vmem [resolvable:$true] %s32_s19 }
  0x14   :  { %25 = vst.msk [vmem:[#allocation5] sm:$0xff] %vm24_vm1, %v23_v1  ;;  %s65_s20 = scalar_lea.vmem %s33_s19, 128  ;;  %p70_p9 = scmp.lt.s32.totalorder %s33_s19, %s33_s19 }
  0x15   :  { %p66_p8 = scmp.ne.s32.totalorder %s33_s19, %s65_s20  ;;  %p71_p10 = scmp.lt.s32.totalorder %s65_s20, %s65_s20 }
  0x17   :  { %p72_p11 = por %p71_p10, %p70_p9 }
  0x19   :  { %p73_p12 = pnand %p72_p11, %p66_p8 }
  0x1b   :  { %76 = shalt.err (!%p73_p12)
}
  0x1c   :  { %s77_s0 = scalar_lea.hbm %s128_s1, 128 }
  0x1d   :  { %p78_p13 = scmp.ne.s32.totalorder %s128_s1, %s77_s0  ;;  %p81_p0 = scmp.lt.u32.totalorder %s77_s0, %s128_s1 }
  0x1f   :  { %p83_p1 = pnand %p81_p0, %p78_p13 }
  0x21   :  { %86 = shalt.err (!%p83_p1)
}
  0x22   :  { %35 = dma.vmem_to_hbm [thread:$0]  %s33_s19, 128, %s128_s1, [#allocation4]  }
  0x23   :  { %89 = dma.done.wait [#allocation4], 128  }
  0x24   :  { %90 = vsyncadd [#allocation4], 4294967168 }
  0x25   :  { %39 = vsyncpa [#allocation3], 1 }
  0x26   :  { %40 = vsyncpa [#allocation4], 1 }

</bundles_post_ra>
